<compile_context>
chip_gen: v7x
topology: tpu7x:2x2x1
jax: 0.10.0
libtpu: 0.0.40
codegen_flags: <defaults>
</compile_context>

<pallas_src>
import jax
import jax.numpy as jnp
from jax.experimental import pallas as pl
from jax.experimental.pallas import tpu as pltpu

_EP = 1e-08
_LANES = 128
_SUBLANES = 8
_TARGET_BLOCK_ROWS = 2048  # (2048, 128) f32 block = 1 MiB per input


def _ceil_div(a, b):
    return -(-a // b)


def _make_dice_kernel(block_rows, total_rows, inner_steps, needs_mask):
    def kernel(t_ref, p_ref, o_pt_ref, o_s_ref, acc_pt, acc_s):
        c_id = pl.program_id(0)
        s_id = pl.program_id(1)

        @pl.when(s_id == 0)
        def _():
            acc_pt[...] = jnp.zeros_like(acc_pt)
            acc_s[...] = jnp.zeros_like(acc_s)

        t = t_ref[...].astype(jnp.float32)
        p = p_ref[...].astype(jnp.float32)

        pt = p * t
        ps = p + t
        if needs_mask:
            # Zero out rows past the end of the slab; this also nullifies
            # duplicated (clamped) trailing grid steps.
            row0 = (c_id * inner_steps + s_id) * block_rows
            row_ids = jax.lax.broadcasted_iota(
                jnp.int32, (block_rows, _LANES), 0)
            keep = row_ids < (total_rows - row0)
            pt = jnp.where(keep, pt, 0.0)
            ps = jnp.where(keep, ps, 0.0)

        acc_pt[...] += pt
        acc_s[...] += ps

        @pl.when(s_id == inner_steps - 1)
        def _():
            o_pt_ref[0] = jnp.sum(acc_pt[...], axis=0, keepdims=True)
            o_s_ref[0] = jnp.sum(acc_s[...], axis=0, keepdims=True)

    return kernel


def dice_loss(target, predictive, ep=_EP):
    """Pallas TPU implementation of DiceLoss.forward(target, predictive)."""
    assert target.shape == predictive.shape

    def _prep(x):
        if not jnp.issubdtype(x.dtype, jnp.floating):
            x = x.astype(jnp.float32)  # keep floating inputs in native dtype
        return jnp.ravel(x)

    t_flat = _prep(target)
    p_flat = _prep(predictive)

    n = t_flat.shape[0]
    align = _SUBLANES * _LANES  # 1024: minimal slab alignment (NOT block size)
    n_pad = _ceil_div(n, align) * align
    if n_pad != n:
        # Sub-1024-element zero pad; zeros contribute nothing to any sum.
        t_flat = jnp.pad(t_flat, (0, n_pad - n))
        p_flat = jnp.pad(p_flat, (0, n_pad - n))

    rows = n_pad // _LANES                       # multiple of 8
    block_rows = min(_TARGET_BLOCK_ROWS, rows)   # multiple of 8
    n_blocks = _ceil_div(rows, block_rows)
    n_cores = 2 if n_blocks >= 2 else 1          # split rows over TCs (v7x)
    inner = _ceil_div(n_blocks, n_cores)
    needs_mask = (n_cores * inner * block_rows != rows)

    t2 = t_flat.reshape(rows, _LANES)
    p2 = p_flat.reshape(rows, _LANES)

    if n_cores * inner == n_blocks:
        in_index = lambda c, s: (c * inner + s, 0)
    else:
        # Duplicate trailing grid steps re-read the last real block; their
        # contribution is masked to zero inside the kernel.
        in_index = lambda c, s: (jnp.minimum(c * inner + s, n_blocks - 1), 0)

    kernel = _make_dice_kernel(block_rows, rows, inner, needs_mask)

    bytes_accessed = n * (t2.dtype.itemsize + p2.dtype.itemsize)
    o_pt, o_s = pl.pallas_call(
        kernel,
        out_shape=(
            jax.ShapeDtypeStruct((n_cores, 1, _LANES), jnp.float32),
            jax.ShapeDtypeStruct((n_cores, 1, _LANES), jnp.float32),
        ),
        grid_spec=pltpu.PrefetchScalarGridSpec(
            num_scalar_prefetch=0,
            grid=(n_cores, inner),
            in_specs=[
                pl.BlockSpec((block_rows, _LANES), in_index),
                pl.BlockSpec((block_rows, _LANES), in_index),
            ],
            out_specs=(
                pl.BlockSpec((1, 1, _LANES), lambda c, s: (c, 0, 0)),
                pl.BlockSpec((1, 1, _LANES), lambda c, s: (c, 0, 0)),
            ),
            scratch_shapes=[
                pltpu.VMEM((block_rows, _LANES), jnp.float32),
                pltpu.VMEM((block_rows, _LANES), jnp.float32),
            ],
        ),
        compiler_params=pltpu.CompilerParams(
            dimension_semantics=("parallel", "arbitrary"),
        ),
        cost_estimate=pl.CostEstimate(
            flops=3 * n, transcendentals=0, bytes_accessed=bytes_accessed),
    )(t2, p2)

    sum_pt = jnp.sum(o_pt)          # sum(predictive * target)
    sum_s = jnp.sum(o_s)            # sum(predictive) + sum(target)
    intersection = 2.0 * sum_pt + ep
    union = sum_s + ep
    return 1.0 - intersection / union


def _dice_loss_ref(target, predictive, ep=_EP):
    t = target.astype(jnp.float32)
    p = predictive.astype(jnp.float32)
    intersection = 2.0 * jnp.sum(p * t) + ep
    union = jnp.sum(p) + jnp.sum(t) + ep
    return 1.0 - intersection / union


if __name__ == "__main__":
    key = jax.random.PRNGKey(0)

    # Primary small test (NCHW, consistent with a segmentation use-case).
    k1, k2 = jax.random.split(key)
    target = (jax.random.uniform(k1, (2, 4, 16, 16)) > 0.5).astype(jnp.float32)
    predictive = jax.random.uniform(k2, (2, 4, 16, 16), dtype=jnp.float32)
    loss = jax.block_until_ready(dice_loss(target, predictive))
    ref = _dice_loss_ref(target, predictive)
    assert jnp.allclose(loss, ref, atol=1e-5, rtol=1e-5), (loss, ref)

    # Exercise the multi-block, masked-remainder and two-core-split paths.
    for shape in [(2, 8, 160, 160), (2, 5, 250, 256)]:
        ka, kb = jax.random.split(jax.random.fold_in(key, shape[-1]))
        t = (jax.random.uniform(ka, shape) > 0.5).astype(jnp.float32)
        p = jax.random.uniform(kb, shape, dtype=jnp.float32)
        got = jax.block_until_ready(dice_loss(t, p))
        want = _dice_loss_ref(t, p)
        assert jnp.allclose(got, want, atol=1e-4, rtol=1e-4), (shape, got, want)

    print("KERNEL_OK")
</pallas_src>

<mosaic_0001>
module attributes {stable_mosaic.version = 11 : i64} {
  func.func @kernel(%arg0: i32, %arg1: i32, %arg2: memref<16x128xf32, #tpu.memory_space<vmem>>, %arg3: memref<16x128xf32, #tpu.memory_space<vmem>>, %arg4: memref<1x1x128xf32, #tpu.memory_space<vmem>>, %arg5: memref<1x1x128xf32, #tpu.memory_space<vmem>>, %arg6: memref<16x128xf32, #tpu.memory_space<vmem>>, %arg7: memref<16x128xf32, #tpu.memory_space<vmem>>) attributes {dimension_semantics = [#tpu.dimension_semantics<parallel>, #tpu.dimension_semantics<arbitrary>], iteration_bounds = array<i64: 1, 1>, scalar_prefetch = 0 : i64, scratch_operands = 2 : i64, tpu.core_type = #tpu.core_type<tc>, window_params = [{transform_indices = @transform_0, window_bounds = array<i64: 16, 128>}, {transform_indices = @transform_1, window_bounds = array<i64: 16, 128>}, {transform_indices = @transform_2, window_bounds = array<i64: 1, 1, 128>}, {transform_indices = @transform_3, window_bounds = array<i64: 1, 1, 128>}]} {
    %c0_i32 = arith.constant 0 : i32
    %0 = arith.cmpi eq, %arg1, %c0_i32 : i32
    %1 = arith.extui %0 : i1 to i32
    %c0_i32_0 = arith.constant 0 : i32
    %2 = arith.cmpi ne, %1, %c0_i32_0 : i32
    scf.if %2 {
      %cst = arith.constant 0.000000e+00 : f32
      %16 = vector.broadcast %cst : f32 to vector<16x128xf32>
      %c0_14 = arith.constant 0 : index
      %c0_15 = arith.constant 0 : index
      %17 = vector.load %arg6[%c0_14, %c0_15] : memref<16x128xf32, #tpu.memory_space<vmem>>, vector<16x128xf32>
      tpu.vector_store %arg6[%c0_14, %c0_15], %16 {strides = array<i32>} : memref<16x128xf32, #tpu.memory_space<vmem>>, vector<16x128xf32>,
      %cst_16 = arith.constant 0.000000e+00 : f32
      %18 = vector.broadcast %cst_16 : f32 to vector<16x128xf32>
      %c0_17 = arith.constant 0 : index
      %c0_18 = arith.constant 0 : index
      %19 = vector.load %arg7[%c0_17, %c0_18] : memref<16x128xf32, #tpu.memory_space<vmem>>, vector<16x128xf32>
      tpu.vector_store %arg7[%c0_17, %c0_18], %18 {strides = array<i32>} : memref<16x128xf32, #tpu.memory_space<vmem>>, vector<16x128xf32>,
    } else {
    }
    %c0 = arith.constant 0 : index
    %c0_1 = arith.constant 0 : index
    %3 = vector.load %arg2[%c0, %c0_1] : memref<16x128xf32, #tpu.memory_space<vmem>>, vector<16x128xf32>
    %c0_2 = arith.constant 0 : index
    %c0_3 = arith.constant 0 : index
    %4 = vector.load %arg3[%c0_2, %c0_3] : memref<16x128xf32, #tpu.memory_space<vmem>>, vector<16x128xf32>
    %5 = arith.mulf %4, %3 : vector<16x128xf32>
    %6 = arith.addf %4, %3 : vector<16x128xf32>
    %c0_4 = arith.constant 0 : index
    %c0_5 = arith.constant 0 : index
    %7 = vector.load %arg6[%c0_4, %c0_5] : memref<16x128xf32, #tpu.memory_space<vmem>>, vector<16x128xf32>
    %8 = arith.addf %7, %5 : vector<16x128xf32>
    %c0_6 = arith.constant 0 : index
    %c0_7 = arith.constant 0 : index
    %9 = vector.load %arg6[%c0_6, %c0_7] : memref<16x128xf32, #tpu.memory_space<vmem>>, vector<16x128xf32>
    tpu.vector_store %arg6[%c0_6, %c0_7], %8 {strides = array<i32>} : memref<16x128xf32, #tpu.memory_space<vmem>>, vector<16x128xf32>,
    %c0_8 = arith.constant 0 : index
    %c0_9 = arith.constant 0 : index
    %10 = vector.load %arg7[%c0_8, %c0_9] : memref<16x128xf32, #tpu.memory_space<vmem>>, vector<16x128xf32>
    %11 = arith.addf %10, %6 : vector<16x128xf32>
    %c0_10 = arith.constant 0 : index
    %c0_11 = arith.constant 0 : index
    %12 = vector.load %arg7[%c0_10, %c0_11] : memref<16x128xf32, #tpu.memory_space<vmem>>, vector<16x128xf32>
    tpu.vector_store %arg7[%c0_10, %c0_11], %11 {strides = array<i32>} : memref<16x128xf32, #tpu.memory_space<vmem>>, vector<16x128xf32>,
    %c0_i32_12 = arith.constant 0 : i32
    %13 = arith.cmpi eq, %arg1, %c0_i32_12 : i32
    %14 = arith.extui %13 : i1 to i32
    %c0_i32_13 = arith.constant 0 : i32
    %15 = arith.cmpi ne, %14, %c0_i32_13 : i32
    scf.if %15 {
      %c0_14 = arith.constant 0 : index
      %c0_15 = arith.constant 0 : index
      %16 = vector.load %arg6[%c0_14, %c0_15] : memref<16x128xf32, #tpu.memory_space<vmem>>, vector<16x128xf32>
      %cst = arith.constant dense<0.000000e+00> : vector<128xf32>
      %17 = vector.multi_reduction <add>, %16, %cst [0] : vector<16x128xf32> to vector<128xf32>
      %18 = vector.shape_cast %17 : vector<128xf32> to vector<1x128xf32>
      %c0_16 = arith.constant 0 : index
      %c0_17 = arith.constant 0 : index
      %c0_18 = arith.constant 0 : index
      %19 = vector.load %arg4[%c0_16, %c0_17, %c0_18] : memref<1x1x128xf32, #tpu.memory_space<vmem>>, vector<1x1x128xf32>
      %20 = vector.shape_cast %19 : vector<1x1x128xf32> to vector<1x128xf32>
      %21 = vector.shape_cast %18 : vector<1x128xf32> to vector<1x1x128xf32>
      tpu.vector_store %arg4[%c0_16, %c0_17, %c0_18], %21 {strides = array<i32>} : memref<1x1x128xf32, #tpu.memory_space<vmem>>, vector<1x1x128xf32>,
      %c0_19 = arith.constant 0 : index
      %c0_20 = arith.constant 0 : index
      %22 = vector.load %arg7[%c0_19, %c0_20] : memref<16x128xf32, #tpu.memory_space<vmem>>, vector<16x128xf32>
      %cst_21 = arith.constant dense<0.000000e+00> : vector<128xf32>
      %23 = vector.multi_reduction <add>, %22, %cst_21 [0] : vector<16x128xf32> to vector<128xf32>
      %24 = vector.shape_cast %23 : vector<128xf32> to vector<1x128xf32>
      %c0_22 = arith.constant 0 : index
      %c0_23 = arith.constant 0 : index
      %c0_24 = arith.constant 0 : index
      %25 = vector.load %arg5[%c0_22, %c0_23, %c0_24] : memref<1x1x128xf32, #tpu.memory_space<vmem>>, vector<1x1x128xf32>
      %26 = vector.shape_cast %25 : vector<1x1x128xf32> to vector<1x128xf32>
      %27 = vector.shape_cast %24 : vector<1x128xf32> to vector<1x1x128xf32>
      tpu.vector_store %arg5[%c0_22, %c0_23, %c0_24], %27 {strides = array<i32>} : memref<1x1x128xf32, #tpu.memory_space<vmem>>, vector<1x1x128xf32>,
    } else {
    }
    return
  }
  func.func @transform_0(%arg0: i32, %arg1: i32) -> (i32, i32) {
    %c1_i32 = arith.constant 1 : i32
    %0 = arith.muli %arg0, %c1_i32 : i32
    %1 = arith.addi %0, %arg1 : i32
    %c0_i32 = arith.constant 0 : i32
    %c0_i32_0 = arith.constant 0 : i32
    return %1, %c0_i32 : i32, i32
  }
  func.func @transform_1(%arg0: i32, %arg1: i32) -> (i32, i32) {
    %c1_i32 = arith.constant 1 : i32
    %0 = arith.muli %arg0, %c1_i32 : i32
    %1 = arith.addi %0, %arg1 : i32
    %c0_i32 = arith.constant 0 : i32
    %c0_i32_0 = arith.constant 0 : i32
    return %1, %c0_i32 : i32, i32
  }
  func.func @transform_2(%arg0: i32, %arg1: i32) -> (i32, i32, i32) {
    %c0_i32 = arith.constant 0 : i32
    %c0_i32_0 = arith.constant 0 : i32
    %c0_i32_1 = arith.constant 0 : i32
    return %arg0, %c0_i32, %c0_i32_0 : i32, i32, i32
  }
  func.func @transform_3(%arg0: i32, %arg1: i32) -> (i32, i32, i32) {
    %c0_i32 = arith.constant 0 : i32
    %c0_i32_0 = arith.constant 0 : i32
    %c0_i32_1 = arith.constant 0 : i32
    return %arg0, %c0_i32, %c0_i32_0 : i32, i32, i32
  }
}

</mosaic_0001>

<bundles_post_ra>
// kernel: tpu_custom_call.1
= control target key start
LH: loop header
LB: loop body
LE: loop exit
PB: predicated region body
PF: predicated region fallthrough
CT: control target
= control target key end

     0   :  { %9 = vsyncpa [#allocation5], 0  ;;  %s320_s0 = inlined_call_operand.hbm [shape: f32[16,128], index: 0, kind: input, shape index: {}]   ;;  %s321_s1 = inlined_call_operand.hbm [shape: f32[16,128], index: 1, kind: input, shape index: {}]   ;;  %s322_s2 = inlined_call_operand.hbm [shape: f32[1,1,128], index: 2, kind: output, shape index: {0}]   ;;  %s323_s3 = inlined_call_operand.hbm [shape: f32[1,1,128], index: 3, kind: output, shape index: {1}]  }
   0x1   :  { %10 = vsyncpa [#allocation8], 0 }
   0x2   :  { %11 = vsyncpa [#allocation6], 0 }
   0x3   :  { %12 = vsyncpa [#allocation11], 0  ;;  %s238_s12 = smov [#allocation4]   ;;  %s142_s16 = scalar_lea.hbm %s320_s0, 256 }
   0x4   :  { %s22_s13 = sshll.u32 %s238_s12, 4  ;;  %p143_p0 = scmp.ne.s32.totalorder %s320_s0, %s142_s16  ;;  %s23_s13 = int_to_ptr.vmem [resolvable:$true] %s22_s13 }
   0x5   :  { %p146_p1 = scmp.lt.u32.totalorder %s142_s16, %s320_s0 }
   0x7   :  { %p148_p2 = pnand %p146_p1, %p143_p0 }
   0x9   :  { %151 = shalt.err (!%p148_p2)
}
   0xa   :  { %s152_s21 = scalar_lea.vmem %s23_s13, 256  ;;  %p157_p4 = scmp.lt.s32.totalorder %s23_s13, %s23_s13 }
   0xb   :  { %p153_p3 = scmp.ne.s32.totalorder %s23_s13, %s152_s21  ;;  %p158_p5 = scmp.lt.s32.totalorder %s152_s21, %s152_s21 }
   0xd   :  { %p159_p6 = por %p158_p5, %p157_p4 }
   0xf   :  { %p160_p7 = pnand %p159_p6, %p153_p3 }
  0x11   :  { %163 = shalt.err (!%p160_p7)
}
  0x12   :  { %s239_s22 = smov 128   ;;  %s240_s23 = smov 8  }
  0x13   :  { %28 = dma.hbm_to_vmem [thread:$0]  %s320_s0, 256, %s23_s13, [#allocation5], %s239_s22, %s239_s22, %s240_s23  }
  0x14   :  { %s241_s26 = smov [#allocation7]   ;;  %s164_s30 = scalar_lea.hbm %s321_s1, 256 }
  0x15   :  { %s38_s27 = sshll.u32 %s241_s26, 4  ;;  %p165_p8 = scmp.ne.s32.totalorder %s321_s1, %s164_s30  ;;  %s39_s27 = int_to_ptr.vmem [resolvable:$true] %s38_s27 }
  0x16   :  { %p168_p9 = scmp.lt.u32.totalorder %s164_s30, %s321_s1 }
  0x18   :  { %p170_p10 = pnand %p168_p9, %p165_p8 }
  0x1a   :  { %173 = shalt.err (!%p170_p10)
}
  0x1b   :  { %s174_s8 = scalar_lea.vmem %s39_s27, 256  ;;  %p179_p12 = scmp.lt.s32.totalorder %s39_s27, %s39_s27 }
  0x1c   :  { %p175_p11 = scmp.ne.s32.totalorder %s39_s27, %s174_s8  ;;  %p180_p13 = scmp.lt.s32.totalorder %s174_s8, %s174_s8 }
  0x1e   :  { %p181_p0 = por %p180_p13, %p179_p12 }
  0x20   :  { %p182_p1 = pnand %p181_p0, %p175_p11 }
  0x22   :  { %185 = shalt.err (!%p182_p1)
}
  0x23   :  { %44 = dma.hbm_to_vmem [thread:$0]  %s321_s1, 256, %s39_s27, [#allocation8], %s239_s22, %s239_s22, %s240_s23  }
  0x24   :  { %230 = dma.done.wait [#allocation5], 256  }
  0x25   :  { %231 = vsyncadd [#allocation5], 4294967040 }
  0x26   :  { %232 = dma.done.wait [#allocation8], 256  }
  0x27   :  { %233 = vsyncadd [#allocation8], 4294967040  ;;  %v63_v0 = vld [vmem:[#allocation4] sm:$0xff]  ;;  %v64_v1 = vld [vmem:[#allocation4 + $0x8] sm:$0xff]  ;;  %s242_s1 = smov [#allocation9]   ;;  %s243_s11 = smov [#allocation10]  }
  0x28   :  { %v65_v2 = vld [vmem:[#allocation7] sm:$0xff]  ;;  %v66_v3 = vld [vmem:[#allocation7 + $0x8] sm:$0xff]  ;;  %s112_s10 = sshll.u32 %s242_s1, 4  ;;  %s122_s12 = sshll.u32 %s243_s11, 4  ;;  %s113_s10 = int_to_ptr.vmem [resolvable:$true] %s112_s10  ;;  %s288_s12 = int_to_ptr.vmem [resolvable:$true] %s122_s12 }
  0x29   :  { %v67_v4 = vmul.f32 %v65_v2, %v63_v0  ;;  %v69_v5 = vadd.f32 %v65_v2, %v63_v0  ;;  %v68_v6 = vmul.f32 %v66_v3, %v64_v1  ;;  %v70_v7 = vadd.f32 %v66_v3, %v64_v1  ;;  %s186_s13 = scalar_lea.vmem %s113_s10, 16  ;;  %s190_s14 = scalar_lea.vmem %s113_s10, 32 }
  0x2a   :  { %p187_p2 = scmp.ne.s32.totalorder %s113_s10, %s186_s13  ;;  %p191_p3 = scmp.lt.s32.totalorder %s113_s10, %s113_s10 }
  0x2b   :  { %v88_v8 = vadd.f32 %v68_v6, %v67_v4  ;;  %v98_v9 = vadd.f32 %v70_v7, %v69_v5  ;;  %p192_p4 = scmp.lt.s32.totalorder %s190_s14, %s186_s13 }
  0x2d   :  { %v89_v10 = vrot.slane %v88_v8, 4  ;;  %v99_v11 = vrot.slane %v98_v9, 4  ;;  %p193_p5 = por %p192_p4, %p191_p3 }
  0x2f   :  { %v90_v12 = vadd.f32 %v89_v10, %v88_v8  ;;  %v100_v13 = vadd.f32 %v99_v11, %v98_v9  ;;  %p194_p6 = pnand %p193_p5, %p187_p2 }
  0x31   :  { %v91_v14 = vrot.slane %v90_v12, 2  ;;  %v101_v15 = vrot.slane %v100_v13, 2 }
  0x33   :  { %v92_v16 = vadd.f32 %v91_v14, %v90_v12  ;;  %v102_v17 = vadd.f32 %v101_v15, %v100_v13 }
  0x35   :  { %v93_v18 = vrot.slane %v92_v16, 1  ;;  %v103_v19 = vrot.slane %v102_v17, 1 }
  0x37   :  { %v94_v20 = vadd.f32 %v93_v18, %v92_v16  ;;  %v104_v21 = vadd.f32 %v103_v19, %v102_v17 }
  0x39   :  { %95 = vst [vmem:[#allocation9] sm:$0x1] %v94_v20  ;;  %105 = vst [vmem:[#allocation10] sm:$0x1] %v104_v21 }
  0x3a   :  { %197 = shalt.err (!%p194_p6)
}
  0x3b   :  { %s198_s17 = scalar_lea.hbm %s322_s2, 16 }
  0x3c   :  { %p199_p7 = scmp.ne.s32.totalorder %s322_s2, %s198_s17  ;;  %p202_p8 = scmp.lt.u32.totalorder %s198_s17, %s322_s2 }
  0x3e   :  { %p204_p9 = pnand %p202_p8, %p199_p7 }
  0x40   :  { %207 = shalt.err (!%p204_p9)
}
  0x41   :  { %115 = dma.vmem_to_hbm [thread:$0]  %s113_s10, 16, %s322_s2, [#allocation6]  }
  0x42   :  { %s208_s24 = scalar_lea.vmem %s288_s12, 16  ;;  %s212_s25 = scalar_lea.vmem %s288_s12, 32 }
  0x43   :  { %p209_p10 = scmp.ne.s32.totalorder %s288_s12, %s208_s24  ;;  %p213_p11 = scmp.lt.s32.totalorder %s288_s12, %s288_s12 }
  0x44   :  { %p214_p12 = scmp.lt.s32.totalorder %s212_s25, %s208_s24 }
  0x46   :  { %p215_p13 = por %p214_p12, %p213_p11 }
  0x48   :  { %p216_p0 = pnand %p215_p13, %p209_p10 }
  0x4a   :  { %219 = shalt.err (!%p216_p0)
}
  0x4b   :  { %s220_s28 = scalar_lea.hbm %s323_s3, 16 }
  0x4c   :  { %p221_p1 = scmp.ne.s32.totalorder %s323_s3, %s220_s28  ;;  %p224_p2 = scmp.lt.u32.totalorder %s220_s28, %s323_s3 }
  0x4e   :  { %p226_p3 = pnand %p224_p2, %p221_p1 }
  0x50   :  { %229 = shalt.err (!%p226_p3)
}
  0x51   :  { %125 = dma.vmem_to_hbm [thread:$0]  %s288_s12, 16, %s323_s3, [#allocation11]  }
  0x52   :  { %234 = dma.done.wait [#allocation6], 16  }
  0x53   :  { %235 = vsyncadd [#allocation6], 4294967280 }
  0x54   :  { %236 = dma.done.wait [#allocation11], 16  }
  0x55   :  { %237 = vsyncadd [#allocation11], 4294967280 }
  0x56   :  { %132 = vsyncpa [#allocation5], 1 }
  0x57   :  { %133 = vsyncpa [#allocation8], 1 }
  0x58   :  { %134 = vsyncpa [#allocation6], 1 }
  0x59   :  { %135 = vsyncpa [#allocation11], 1 }

</bundles_post_ra>
